<compile_context>
chip_gen: v6e
topology: v6e:2x2x1
jax: 0.10.0
libtpu: 0.0.40
codegen_flags: <defaults>
</compile_context>

<pallas_src>
import math
from functools import partial

import jax
import jax.numpy as jnp
from jax.experimental import pallas as pl
from jax.experimental.pallas import tpu as pltpu


# --------------------------------- helpers ----------------------------------

def _vmem_cap_bytes():
    """Generation-aware usable VMEM (leave ~1/8 headroom for Mosaic scratch)."""
    phys = 64 << 20                       # conservative default (v7x: 64 MiB / TC)
    try:
        phys = int(pltpu.get_tpu_info().vmem_capacity_bytes)
    except Exception:
        pass
    return int(min((phys * 7) // 8, 112 << 20))   # ~56 MiB v7x, ~112 MiB v5e/v6e


def _tile_targets():
    """Per-generation default (q_tile, kv_tile) targets."""
    try:
        kind = jax.devices()[0].device_kind.lower()
    except Exception:
        kind = ""
    if "v5 lite" in kind or "v5e" in kind or "v5litepod" in kind:
        return 256, 256                   # 128-deep MXU on v5e
    return 256, 512                       # v6e / v7x (256-deep MXU)


def _choose_tile(s, target, align):
    """Largest multiple of `align` that divides s and is <= target (else s)."""
    if s <= target:
        return s
    t = (min(target, s) // align) * align
    while t >= align:
        if s % t == 0:
            return t
        t -= align
    return s


def _attn_vmem_bytes(H, hd, D, tq, tk, cdt_size, io_size, has_mask):
    f32 = 4
    est = 2 * H * tq * hd * cdt_size             # q block (double buffered)
    est += 2 * 2 * H * tk * hd * cdt_size        # k, v blocks (double buffered)
    est += 2 * tq * D * io_size                  # out block (double buffered)
    est += D * D * cdt_size + D * f32            # Wout, bout (single buffered)
    if has_mask:
        est += 2 * tq * tk * f32                 # mask tile (double buffered)
    est += (2 + hd) * H * tq * f32               # m, l, acc scratch
    est += 3 * H * tq * tk * f32                 # scores / exp temporaries
    est += 2 * H * tq * hd * f32                 # p@v result + rescaled acc
    est += 3 * tq * D * f32                      # finalize relayout / projection temps
    return est


def _proj_vmem_bytes(H, hd, D, tp, cdt_size, io_size):
    f32 = 4
    est = 2 * tp * D * io_size                   # x block (double buffered)
    est += D * 3 * D * cdt_size + 3 * D * f32    # Wqkv, bqkv (single buffered)
    est += 2 * 3 * H * tp * hd * cdt_size        # q/k/v output blocks (double buffered)
    est += tp * 3 * D * (f32 + cdt_size)         # f32 accumulation + slab cast
    est += 3 * H * tp * hd * cdt_size            # head relayout temporaries
    return est


# --------------------------------- kernels ----------------------------------

def _qkv_proj_kernel(x_ref, wqkv_ref, bqkv_ref, q_ref, k_ref, v_ref, *,
                     num_heads, head_dim, compute_dtype):
    tp, D = x_ref.shape
    x = x_ref[...].astype(compute_dtype)
    # One wide MXU matmul against blocked [Q | K | V] weights (attention scale
    # already folded into the Q slab on host), f32 accumulation, one slab cast.
    qkv = jnp.dot(x, wqkv_ref[...], preferred_element_type=jnp.float32) + bqkv_ref[...]
    qkv = qkv.astype(compute_dtype)

    def to_heads(slab):                           # (tp, D) -> (H, tp, hd)
        return jnp.transpose(slab.reshape(tp, num_heads, head_dim), (1, 0, 2))

    q_ref[...] = to_heads(qkv[:, :D]).astype(q_ref.dtype)
    k_ref[...] = to_heads(qkv[:, D:2 * D]).astype(k_ref.dtype)
    v_ref[...] = to_heads(qkv[:, 2 * D:]).astype(v_ref.dtype)


def _flash_attn_kernel(q_ref, k_ref, v_ref, *rest, num_heads, head_dim,
                       compute_dtype, has_mask, causal):
    if has_mask:
        mask_ref, wout_ref, bout_ref, o_ref, m_sc, l_sc, acc_sc = rest
    else:
        wout_ref, bout_ref, o_ref, m_sc, l_sc, acc_sc = rest
        mask_ref = None

    H, tq, hd = q_ref.shape
    tk = k_ref.shape[1]
    D = num_heads * head_dim

    kv_i = pl.program_id(2)
    q0 = pl.program_id(1) * tq
    k0 = kv_i * tk

    @pl.when(kv_i == 0)
    def _init():
        m_sc[...] = jnp.full(m_sc.shape, -jnp.inf, dtype=m_sc.dtype)
        l_sc[...] = jnp.zeros(l_sc.shape, dtype=l_sc.dtype)
        acc_sc[...] = jnp.zeros(acc_sc.shape, dtype=acc_sc.dtype)

    def update():
        # Scale is folded into q; contraction over head_dim, batched over heads.
        s = jnp.einsum("hqd,hkd->hqk", q_ref[...], k_ref[...],
                       preferred_element_type=jnp.float32)        # (H, tq, tk)
        if mask_ref is not None:
            s = s + mask_ref[...]                                 # broadcasts over heads
        if causal:
            rows = q0 + jax.lax.broadcasted_iota(jnp.int32, (tq, tk), 0)
            cols = k0 + jax.lax.broadcasted_iota(jnp.int32, (tq, tk), 1)
            s = s + jnp.where(rows >= cols, 0.0, -1e9)            # additive, like ref

        m_prev = m_sc[...]
        m_new = jnp.maximum(m_prev, jnp.max(s, axis=-1, keepdims=True))
        alpha = jnp.exp(m_prev - m_new)
        p = jnp.exp(s - m_new)
        l_sc[...] = alpha * l_sc[...] + jnp.sum(p, axis=-1, keepdims=True)
        acc_sc[...] = alpha * acc_sc[...] + jnp.einsum(
            "hqk,hkd->hqd", p.astype(compute_dtype), v_ref[...],
            preferred_element_type=jnp.float32)
        m_sc[...] = m_new

    if causal:
        # Skip kv tiles lying entirely above the diagonal (fully masked).
        @pl.when(k0 <= q0 + tq - 1)
        def _():
            update()
    else:
        update()

    @pl.when(kv_i == pl.num_programs(2) - 1)
    def _finalize():
        o = acc_sc[...] * pl.reciprocal(l_sc[...], approx=False)   # (H, tq, hd)
        # Single unavoidable head-major -> feature-major relayout per q tile.
        vals = jnp.transpose(o, (1, 0, 2)).reshape(tq, D)
        out = jnp.dot(vals.astype(compute_dtype), wout_ref[...],
                      preferred_element_type=jnp.float32) + bout_ref[...]
        o_ref[...] = out.astype(o_ref.dtype)


# --------------------------------- wrapper ----------------------------------

def multi_head_attention(x, wqkv, bqkv, wout, bout, mask=None, *, num_heads,
                         causal=False, compute_dtype=jnp.bfloat16,
                         q_tile=None, kv_tile=None):
    """x: (B, S, D); wqkv: (D, 3D) in x@W layout; bqkv: (3D,); wout: (D, D); bout: (D,).

    mask   : optional additive (S, S) mask, broadcast over batch and heads.
    causal : build the additive causal mask in-kernel (no (S, S) HBM array).
    compute_dtype: MXU input dtype (default bf16); accumulation / softmax are f32.
    """
    B, S, D = x.shape
    assert D % num_heads == 0
    head_dim = D // num_heads
    compute_dtype = jnp.dtype(compute_dtype)
    cdt_size = compute_dtype.itemsize
    io_size = x.dtype.itemsize
    has_mask = mask is not None

    # ---- host-side (one-time in a real model) weight preparation -----------
    # 1) reorder interleaved per-head [q_h|k_h|v_h] columns into blocked [Q|K|V];
    # 2) fold the 1/sqrt(head_dim) attention scale into the Q slab (W and bias).
    scale = 1.0 / math.sqrt(head_dim)
    w3 = wqkv.reshape(D, num_heads, 3, head_dim)
    b3 = bqkv.reshape(num_heads, 3, head_dim)
    wq = (w3[:, :, 0, :] * scale).reshape(D, D)
    wk = w3[:, :, 1, :].reshape(D, D)
    wv = w3[:, :, 2, :].reshape(D, D)
    bq = (b3[:, 0, :] * scale).reshape(1, D)
    bk = b3[:, 1, :].reshape(1, D)
    bv = b3[:, 2, :].reshape(1, D)
    wqkv_b = jnp.concatenate([wq, wk, wv], axis=1).astype(compute_dtype)   # (D, 3D)
    bqkv_b = jnp.concatenate([bq, bk, bv], axis=1).astype(jnp.float32)     # (1, 3D)
    wout_c = wout.astype(compute_dtype)                                    # (D, D)
    bout_2 = bout.reshape(1, D).astype(jnp.float32)                        # (1, D)

    cap = _vmem_cap_bytes()

    # ----------------------------- 1) QKV projection ------------------------
    tp = _choose_tile(S, 256, 8)
    prev = None
    while (_proj_vmem_bytes(num_heads, head_dim, D, tp, cdt_size, io_size) > cap
           and tp > 8 and tp != prev):
        prev, tp = tp, _choose_tile(S, max(tp // 2, 8), 8)
    if _proj_vmem_bytes(num_heads, head_dim, D, tp, cdt_size, io_size) > cap:
        raise ValueError("QKV-projection tiles do not fit the VMEM budget; "
                         "reduce d_model or num_heads.")

    head_shape = jax.ShapeDtypeStruct((B, num_heads, S, head_dim), compute_dtype)
    qh, kh, vh = pl.pallas_call(
        partial(_qkv_proj_kernel, num_heads=num_heads, head_dim=head_dim,
                compute_dtype=compute_dtype),
        out_shape=(head_shape, head_shape, head_shape),
        grid_spec=pltpu.PrefetchScalarGridSpec(
            num_scalar_prefetch=0,
            grid=(B, S // tp),
            in_specs=[
                pl.BlockSpec((None, tp, D), lambda b, si: (b, si, 0)),
                pl.BlockSpec((D, 3 * D), lambda b, si: (0, 0),
                             pipeline_mode=pl.Buffered(1)),
                pl.BlockSpec((1, 3 * D), lambda b, si: (0, 0),
                             pipeline_mode=pl.Buffered(1)),
            ],
            out_specs=[
                pl.BlockSpec((None, num_heads, tp, head_dim),
                             lambda b, si: (b, 0, si, 0)),
                pl.BlockSpec((None, num_heads, tp, head_dim),
                             lambda b, si: (b, 0, si, 0)),
                pl.BlockSpec((None, num_heads, tp, head_dim),
                             lambda b, si: (b, 0, si, 0)),
            ],
        ),
        compiler_params=pltpu.CompilerParams(
            dimension_semantics=("parallel", "parallel"),
            vmem_limit_bytes=cap),
    )(x, wqkv_b, bqkv_b)

    # ----------------- 2) flash attention + output projection ---------------
    tq_t, tk_t = _tile_targets()
    k_align = 128 if S >= 128 else 8
    tq0 = q_tile or _choose_tile(S, tq_t, 8)
    tk0 = kv_tile or _choose_tile(S, tk_t, k_align)

    def fits(tq_, tk_):
        return _attn_vmem_bytes(num_heads, head_dim, D, tq_, tk_,
                                cdt_size, io_size, has_mask) <= cap

    tq, tk = tq0, tk0
    if not fits(tq, tk):
        found = False
        for q_cand in [c for c in (tq0, 128, 64, 32, 16, 8) if c <= tq0]:
            tq_c = _choose_tile(S, q_cand, 8)
            for k_cand in [c for c in (tk0, 512, 256, 128, 64, 32, 16, 8) if c <= tk0]:
                tk_c = _choose_tile(S, k_cand, k_align)
                if fits(tq_c, tk_c):
                    tq, tk, found = tq_c, tk_c, True
                    break
            if found:
                break
        if not found:
            raise ValueError("Flash-attention tiles do not fit the VMEM budget; "
                             "reduce d_model / num_heads or pass smaller tiles.")

    kernel = partial(_flash_attn_kernel, num_heads=num_heads, head_dim=head_dim,
                     compute_dtype=compute_dtype, has_mask=has_mask, causal=causal)

    in_specs = [
        pl.BlockSpec((None, num_heads, tq, head_dim), lambda b, qi, ki: (b, 0, qi, 0)),
        pl.BlockSpec((None, num_heads, tk, head_dim), lambda b, qi, ki: (b, 0, ki, 0)),
        pl.BlockSpec((None, num_heads, tk, head_dim), lambda b, qi, ki: (b, 0, ki, 0)),
    ]
    args = [qh, kh, vh]
    if has_mask:
        in_specs.append(pl.BlockSpec((tq, tk), lambda b, qi, ki: (qi, ki)))
        args.append(mask.astype(jnp.float32))
    in_specs += [
        pl.BlockSpec((D, D), lambda b, qi, ki: (0, 0), pipeline_mode=pl.Buffered(1)),
        pl.BlockSpec((1, D), lambda b, qi, ki: (0, 0), pipeline_mode=pl.Buffered(1)),
    ]
    args += [wout_c, bout_2]

    return pl.pallas_call(
        kernel,
        out_shape=jax.ShapeDtypeStruct((B, S, D), x.dtype),
        grid_spec=pltpu.PrefetchScalarGridSpec(
            num_scalar_prefetch=0,
            grid=(B, S // tq, S // tk),
            in_specs=in_specs,
            out_specs=pl.BlockSpec((None, tq, D), lambda b, qi, ki: (b, qi, 0)),
            scratch_shapes=[
                pltpu.VMEM((num_heads, tq, 1), jnp.float32),
                pltpu.VMEM((num_heads, tq, 1), jnp.float32),
                pltpu.VMEM((num_heads, tq, head_dim), jnp.float32),
            ],
        ),
        compiler_params=pltpu.CompilerParams(
            dimension_semantics=("parallel", "parallel", "arbitrary"),
            vmem_limit_bytes=cap),
    )(*args)


# -------------------------------- reference ---------------------------------

def _reference_mha(x, wqkv, bqkv, wout, bout, mask, num_heads):
    """Pure-JAX reference mirroring the PyTorch forward exactly."""
    B, S, D = x.shape
    head_dim = D // num_heads
    qkv = x @ wqkv + bqkv                                        # (B, S, 3D)
    qkv = qkv.reshape(B, S, num_heads, 3 * head_dim)
    qkv = jnp.transpose(qkv, (0, 2, 1, 3))                       # (B, H, S, 3hd)
    q, k, v = jnp.split(qkv, 3, axis=-1)                         # each (B, H, S, hd)
    scaled = jnp.einsum("bhqd,bhkd->bhqk", q, k) / math.sqrt(head_dim)
    if mask is not None:
        scaled = scaled + mask
    attn = jax.nn.softmax(scaled, axis=-1)
    values = jnp.einsum("bhqk,bhkd->bhqd", attn, v)
    values = jnp.transpose(values, (0, 2, 1, 3)).reshape(B, S, D)
    return values @ wout + bout


if __name__ == "__main__":
    # Small shapes consistent with the module: batch=2, seq=8, d_model=32, heads=8.
    B, S, D, H = 2, 8, 32, 8

    key = jax.random.PRNGKey(0)
    kx, kw1, kb1, kw2, kb2 = jax.random.split(key, 5)
    x = jax.random.normal(kx, (B, S, D), dtype=jnp.float32)

    # Deterministic init mimicking nn.Linear: U(-1/sqrt(fan_in), 1/sqrt(fan_in)).
    bound = 1.0 / math.sqrt(D)
    wqkv = jax.random.uniform(kw1, (D, 3 * D), minval=-bound, maxval=bound, dtype=jnp.float32)
    bqkv = jax.random.uniform(kb1, (3 * D,), minval=-bound, maxval=bound, dtype=jnp.float32)
    wout = jax.random.uniform(kw2, (D, D), minval=-bound, maxval=bound, dtype=jnp.float32)
    bout = jax.random.uniform(kb2, (D,), minval=-bound, maxval=bound, dtype=jnp.float32)

    tri_mask = jnp.where(jnp.tril(jnp.ones((S, S), dtype=bool)), 0.0, -1e9).astype(jnp.float32)

    # 1) no-mask path, f32 MXU inputs (strict check).
    out = multi_head_attention(x, wqkv, bqkv, wout, bout, mask=None,
                               num_heads=H, compute_dtype=jnp.float32)
    out = jax.block_until_ready(out)
    ref = _reference_mha(x, wqkv, bqkv, wout, bout, None, H)
    assert out.shape == (B, S, D)
    assert jnp.allclose(out, ref, atol=2e-2, rtol=2e-2), "no-mask (f32) mismatch"

    # 2) explicit additive mask path, f32 MXU inputs.
    out_m = multi_head_attention(x, wqkv, bqkv, wout, bout, mask=tri_mask,
                                 num_heads=H, compute_dtype=jnp.float32)
    out_m = jax.block_until_ready(out_m)
    ref_m = _reference_mha(x, wqkv, bqkv, wout, bout, tri_mask, H)
    assert jnp.allclose(out_m, ref_m, atol=2e-2, rtol=2e-2), "masked (f32) mismatch"

    # 3) in-kernel causal mask (no (S,S) HBM mask array), f32 MXU inputs.
    out_c = multi_head_attention(x, wqkv, bqkv, wout, bout, mask=None, causal=True,
                                 num_heads=H, compute_dtype=jnp.float32)
    out_c = jax.block_until_ready(out_c)
    assert jnp.allclose(out_c, ref_m, atol=2e-2, rtol=2e-2), "causal (f32) mismatch"

    # 4) default bf16 MXU inputs (f32 accumulation / softmax) -> looser tolerance.
    out_bf = multi_head_attention(x, wqkv, bqkv, wout, bout, mask=tri_mask, num_heads=H)
    out_bf = jax.block_until_ready(out_bf)
    assert jnp.allclose(out_bf, ref_m, atol=5e-2, rtol=5e-2), "masked (bf16) mismatch"

    # TODO(synk): the torch module's debug print() calls are intentionally omitted.
    print("KERNEL_OK")
</pallas_src>

<mosaic_0001>
module attributes {stable_mosaic.version = 11 : i64} {
  func.func @_qkv_proj_kernel(%arg0: i32, %arg1: i32, %arg2: memref<1x8x32xf32, #tpu.memory_space<vmem>>, %arg3: memref<32x96xf32, #tpu.memory_space<vmem>>, %arg4: memref<1x96xf32, #tpu.memory_space<vmem>>, %arg5: memref<1x8x8x4xf32, #tpu.memory_space<vmem>>, %arg6: memref<1x8x8x4xf32, #tpu.memory_space<vmem>>, %arg7: memref<1x8x8x4xf32, #tpu.memory_space<vmem>>) attributes {dimension_semantics = [#tpu.dimension_semantics<parallel>, #tpu.dimension_semantics<parallel>], iteration_bounds = array<i64: 2, 1>, scalar_prefetch = 0 : i64, scratch_operands = 0 : i64, tpu.core_type = #tpu.core_type<tc>, window_params = [{transform_indices = @transform_0, window_bounds = array<i64: 1, 8, 32>}, {pipeline_mode = #tpu.pipeline_mode<synchronous>, transform_indices = @transform_1, window_bounds = array<i64: 32, 96>}, {pipeline_mode = #tpu.pipeline_mode<synchronous>, transform_indices = @transform_2, window_bounds = array<i64: 1, 96>}, {transform_indices = @transform_3, window_bounds = array<i64: 1, 8, 8, 4>}, {transform_indices = @transform_4, window_bounds = array<i64: 1, 8, 8, 4>}, {transform_indices = @transform_5, window_bounds = array<i64: 1, 8, 8, 4>}]} {
    %c0 = arith.constant 0 : index
    %c0_0 = arith.constant 0 : index
    %c0_1 = arith.constant 0 : index
    %0 = vector.load %arg2[%c0, %c0_0, %c0_1] : memref<1x8x32xf32, #tpu.memory_space<vmem>>, vector<1x8x32xf32>
    %1 = vector.shape_cast %0 : vector<1x8x32xf32> to vector<8x32xf32>
    %c0_2 = arith.constant 0 : index
    %c0_3 = arith.constant 0 : index
    %2 = vector.load %arg3[%c0_2, %c0_3] : memref<32x96xf32, #tpu.memory_space<vmem>>, vector<32x96xf32>
    %cst = arith.constant dense<0.000000e+00> : vector<8x96xf32>
    %3 = tpu.matmul %1, %2, %cst {dimension_numbers = #tpu.dot_dimension_numbers<[1], [0], [0], [1], [0, 0, 1, 1], [], []>} : vector<8x32xf32>, vector<32x96xf32>, vector<8x96xf32> -> vector<8x96xf32>
    %c0_4 = arith.constant 0 : index
    %c0_5 = arith.constant 0 : index
    %4 = vector.load %arg4[%c0_4, %c0_5] : memref<1x96xf32, #tpu.memory_space<vmem>>, vector<1x96xf32>
    %5 = vector.broadcast %4 : vector<1x96xf32> to vector<8x96xf32>
    %6 = arith.addf %3, %5 : vector<8x96xf32>
    %7 = vector.extract_strided_slice %6 {offsets = [0, 0], sizes = [8, 32], strides = [1, 1]} : vector<8x96xf32> to vector<8x32xf32>
    %8 = vector.shape_cast %7 : vector<8x32xf32> to vector<8x8x4xf32>
    %9 = tpu.transpose %8, [1, 0, 2] : vector<8x8x4xf32> -> vector<8x8x4xf32>
    %c0_6 = arith.constant 0 : index
    %c0_7 = arith.constant 0 : index
    %c0_8 = arith.constant 0 : index
    %c0_9 = arith.constant 0 : index
    %10 = vector.load %arg5[%c0_6, %c0_7, %c0_8, %c0_9] : memref<1x8x8x4xf32, #tpu.memory_space<vmem>>, vector<1x8x8x4xf32>
    %11 = vector.shape_cast %10 : vector<1x8x8x4xf32> to vector<8x8x4xf32>
    %12 = vector.shape_cast %9 : vector<8x8x4xf32> to vector<1x8x8x4xf32>
    tpu.vector_store %arg5[%c0_6, %c0_7, %c0_8, %c0_9], %12 {strides = array<i32>} : memref<1x8x8x4xf32, #tpu.memory_space<vmem>>, vector<1x8x8x4xf32>,
    %13 = vector.extract_strided_slice %6 {offsets = [0, 32], sizes = [8, 32], strides = [1, 1]} : vector<8x96xf32> to vector<8x32xf32>
    %14 = vector.shape_cast %13 : vector<8x32xf32> to vector<8x8x4xf32>
    %15 = tpu.transpose %14, [1, 0, 2] : vector<8x8x4xf32> -> vector<8x8x4xf32>
    %c0_10 = arith.constant 0 : index
    %c0_11 = arith.constant 0 : index
    %c0_12 = arith.constant 0 : index
    %c0_13 = arith.constant 0 : index
    %16 = vector.load %arg6[%c0_10, %c0_11, %c0_12, %c0_13] : memref<1x8x8x4xf32, #tpu.memory_space<vmem>>, vector<1x8x8x4xf32>
    %17 = vector.shape_cast %16 : vector<1x8x8x4xf32> to vector<8x8x4xf32>
    %18 = vector.shape_cast %15 : vector<8x8x4xf32> to vector<1x8x8x4xf32>
    tpu.vector_store %arg6[%c0_10, %c0_11, %c0_12, %c0_13], %18 {strides = array<i32>} : memref<1x8x8x4xf32, #tpu.memory_space<vmem>>, vector<1x8x8x4xf32>,
    %19 = vector.extract_strided_slice %6 {offsets = [0, 64], sizes = [8, 32], strides = [1, 1]} : vector<8x96xf32> to vector<8x32xf32>
    %20 = vector.shape_cast %19 : vector<8x32xf32> to vector<8x8x4xf32>
    %21 = tpu.transpose %20, [1, 0, 2] : vector<8x8x4xf32> -> vector<8x8x4xf32>
    %c0_14 = arith.constant 0 : index
    %c0_15 = arith.constant 0 : index
    %c0_16 = arith.constant 0 : index
    %c0_17 = arith.constant 0 : index
    %22 = vector.load %arg7[%c0_14, %c0_15, %c0_16, %c0_17] : memref<1x8x8x4xf32, #tpu.memory_space<vmem>>, vector<1x8x8x4xf32>
    %23 = vector.shape_cast %22 : vector<1x8x8x4xf32> to vector<8x8x4xf32>
    %24 = vector.shape_cast %21 : vector<8x8x4xf32> to vector<1x8x8x4xf32>
    tpu.vector_store %arg7[%c0_14, %c0_15, %c0_16, %c0_17], %24 {strides = array<i32>} : memref<1x8x8x4xf32, #tpu.memory_space<vmem>>, vector<1x8x8x4xf32>,
    return
  }
  func.func @transform_0(%arg0: i32, %arg1: i32) -> (i32, i32, i32) {
    %c0_i32 = arith.constant 0 : i32
    %c0_i32_0 = arith.constant 0 : i32
    return %arg0, %arg1, %c0_i32 : i32, i32, i32
  }
  func.func @transform_1(%arg0: i32, %arg1: i32) -> (i32, i32) {
    %c0_i32 = arith.constant 0 : i32
    %c0_i32_0 = arith.constant 0 : i32
    %c0_i32_1 = arith.constant 0 : i32
    return %c0_i32, %c0_i32_0 : i32, i32
  }
  func.func @transform_2(%arg0: i32, %arg1: i32) -> (i32, i32) {
    %c0_i32 = arith.constant 0 : i32
    %c0_i32_0 = arith.constant 0 : i32
    %c0_i32_1 = arith.constant 0 : i32
    return %c0_i32, %c0_i32_0 : i32, i32
  }
  func.func @transform_3(%arg0: i32, %arg1: i32) -> (i32, i32, i32, i32) {
    %c0_i32 = arith.constant 0 : i32
    %c0_i32_0 = arith.constant 0 : i32
    %c0_i32_1 = arith.constant 0 : i32
    return %arg0, %c0_i32, %arg1, %c0_i32_0 : i32, i32, i32, i32
  }
  func.func @transform_4(%arg0: i32, %arg1: i32) -> (i32, i32, i32, i32) {
    %c0_i32 = arith.constant 0 : i32
    %c0_i32_0 = arith.constant 0 : i32
    %c0_i32_1 = arith.constant 0 : i32
    return %arg0, %c0_i32, %arg1, %c0_i32_0 : i32, i32, i32, i32
  }
  func.func @transform_5(%arg0: i32, %arg1: i32) -> (i32, i32, i32, i32) {
    %c0_i32 = arith.constant 0 : i32
    %c0_i32_0 = arith.constant 0 : i32
    %c0_i32_1 = arith.constant 0 : i32
    return %arg0, %c0_i32, %arg1, %c0_i32_0 : i32, i32, i32, i32
  }
}

</mosaic_0001>

<bundles_post_ra>
// kernel: tpu_custom_call.1
= control target key start
LH: loop header
LB: loop body
LE: loop exit
PB: predicated region body
PF: predicated region fallthrough
CT: control target
= control target key end

     0   :  { %11 = vsyncpa [#allocation3], 0  ;;  %s2154_s0 = inlined_call_operand.hbm [shape: f32[2,8,32], index: 0, kind: input, shape index: {}]   ;;  %s2155_s1 = inlined_call_operand.hbm [shape: f32[32,96], index: 1, kind: input, shape index: {}]   ;;  %s2156_s2 = inlined_call_operand.vmem [shape: f32[1,96], index: 2, kind: input, shape index: {}]   ;;  %s2157_s3 = inlined_call_operand.vmem [shape: f32[2,8,8,4], index: 3, kind: output, shape index: {0}]   ;;  %s2158_s4 = inlined_call_operand.vmem [shape: f32[2,8,8,4], index: 4, kind: output, shape index: {1}]   ;;  %s2159_s5 = inlined_call_operand.vmem [shape: f32[2,8,8,4], index: 5, kind: output, shape index: {2}]  }
   0x1   :  { %13 = vsyncpa [#allocation3 + $0x1], 0 }
   0x2   :  { %14 = vsyncpa [#allocation5], 0  ;;  %s1813_s18 = smov 0   ;;  %s1815_s19 = smov 0  }
   0x3   :  { %s1817_s20 = smov 0   ;;  %s1819_s21 = smov 0  }
   0x4   :  { %s1821_s22 = smov 0   ;;  %s1823_s23 = smov 0  }
   0x5 LB: > { %s1512_s24 = sadd.s32 4294967295, %s1764_s23   ;;  %p54_p0 = scmp.ne.s32.totalorder %s1748_s19, %s1744_s18  ;;  %s1764_s23 = sphi %s1823_s23, %s20_s23   ;;  %s1760_s22 = sphi %s1821_s22, %s2169_s22   ;;  %s1756_s21 = sphi %s1819_s21, %s2168_s21   ;;  %s1752_s20 = sphi %s1817_s20, %s2167_s20   ;;  %s1748_s19 = sphi %s1815_s19, %s2166_s19   ;;  %s1744_s18 = sphi %s1813_s18, %s2165_s18  }
   0x6   : > { %p1843_p1 = scmp.eq.s32.totalorder %s1512_s24, 0  ;;  %p1514_p2 = scmp.ge.s32.totalorder %s1764_s23, 1 }
   0x7   : > { %p191_p3 = scmp.lt.s32.totalorder %s1764_s23, 3  ;;  %s1766_s28 = smov [#allocation4]  }
   0x8   : > { %p1851_p4 = por %p1843_p1, %p54_p0  ;;  %s203_s29 = sshll.u32 %s1766_s28, 4  ;;  %s204_s29 = int_to_ptr.vmem [resolvable:$true] %s203_s29 }
   0x9   : > { %p1855_p5 = pnand %p1514_p2, %p191_p3  ;;  %s32_s6 = sadd.s32 1, %s1760_s22 }
   0xa   : > { %s1667_s7 = scalar_lea.vmem %s204_s29, 512  ;;  %p1675_p12 = scmp.lt.s32.totalorder %s204_s29, %s204_s29 }
   0xb   : > { %p1581_p6 = pneg %p1855_p5  ;;  %p1668_p9 = scmp.ne.s32.totalorder %s204_s29, %s1667_s7 }
   0xc   : > { %p1676_p13 = scmp.lt.s32.totalorder %s1667_s7, %s1667_s7 }
   0xd   : > { %p1863_p7 = pnand %p1581_p6, %p1843_p1 }
   0xe   : > { %p1677_p0 = por %p1676_p13, %p1675_p12 }
   0xf   : > { %p1658_p8 = pneg %p1863_p7 }
  0x11   : > { %p1670_p10 = pnand %p1668_p9, %p1658_p8 }
  0x13   : > { %p1671_p11 = pneg %p1670_p10 }
  0x15   : > { %p1678_p2 = pnand %p1677_p0, %p1671_p11 }
  0x17   : > { %1681 = shalt.err (!%p1678_p2)
}
  0x18   : > { %s1767_s8 = smov 128   ;;  %s1768_s9 = smov 8  }
  0x19   : > { %1584 = dma.hbm_to_vmem [thread:$0]  (!%p1863_p7), %s2155_s1, 512, %s204_s29, [#allocation5], %s1767_s8, %s1767_s8, %s1768_s9  }
  0x1a   : > { %p34_p3 = scmp.ge.s32.totalorder %s32_s6, 2  ;;  %s41_s12 = sadd.s32 1, %s1752_s20 }
  0x1b   : > { %p48_p6 = scmp.ne.s32.totalorder %s1752_s20, %s1748_s19  ;;  %p49_p8 = scmp.eq.s32.totalorder %s1764_s23, 0 }
  0x1c   : > { %s2171_s6 = smov (%p34_p3, %s32_s6), 0  ;;  %p1590_p10 = scmp.lt.s32.totalorder %s1764_s23, 2 }
  0x1d   : > { %p50_p9 = por %p49_p8, %p48_p6  ;;  %s36_s13 = ssub.s32 %s1760_s22, %s2171_s6 }
  0x1e   : > { %s220_s14 = sand.u32 1, %s1752_s20   ;;  %p39_p11 = scmp.eq.s32.totalorder %s36_s13, 0 }
  0x1f   : > { %s1517_s15 = sshll.u32 %s220_s14, 3  ;;  %s1518_s16 = sshll.u32 %s1760_s22, 7 }
  0x20   : > { %s1887_s17 = scalar_select %p39_p11, %s1752_s20, %s41_s12  }
  0x21   : > { %s230_s28 = scalar_lea.hbm %s2154_s0, %s1518_s16  ;;  %s224_s29 = scalar_lea.vmem [#allocation2], %s1517_s15 }
  0x22   : > { %s232_s30 = sshll.u32 %s224_s29, 4  ;;  %p1892_p7 = pnand %p1590_p10, %p50_p9  ;;  %s233_s30 = int_to_ptr.vmem [resolvable:$true] %s232_s30 }
  0x23   : > { %s221_s8 = scalar_lea.sflag [#allocation3], %s220_s14  ;;  %s1695_s9 = scalar_lea.vmem %s233_s30, 128 }
  0x24   : > { %p1684_p12 = pneg %p1892_p7  ;;  %p1696_p13 = scmp.ne.s32.totalorder %s233_s30, %s1695_s9 }
  0x25   : > { %s1769_s10 = smov [#allocation2]  }
  0x26   : > { %p1698_p0 = pnand %p1696_p13, %p1684_p12  ;;  %s1700_s11 = sshll.u32 %s1769_s10, 4  ;;  %s1701_s11 = int_to_ptr.vmem [resolvable:$false] %s1700_s11 }
  0x27   : > { %s1702_s12 = scalar_lea.vmem %s1701_s11, 256  ;;  %p1703_p3 = scmp.lt.s32.totalorder %s233_s30, %s1701_s11 }
  0x28   : > { %p1699_p2 = pneg %p1698_p0  ;;  %p1704_p6 = scmp.lt.s32.totalorder %s1702_s12, %s1695_s9 }
  0x2a   : > { %p1705_p8 = por %p1704_p6, %p1703_p3 }
  0x2c   : > { %p1706_p9 = pnand %p1705_p8, %p1699_p2 }
  0x2e   : > { %1709 = shalt.err (!%p1706_p9)
}
  0x2f   : > { %1588 = dma.hbm_to_vmem [thread:$0]  (!%p1892_p7), %s230_s28, 128, %s233_s30, %s221_s8  }
  0x30   : > { %241 = sbr.rel (%p1855_p5) target bundleno = 544 (0x220), region = 32  ;;  %s243_s13 = sand.u32 (!%p1855_p5), 1, %s1748_s19  }
  0x31   : > { %s1520_s14 = sshll.u32 (!%p1855_p5), %s243_s13, 3  ;;  %s244_s15 = scalar_lea.sflag (!%p1855_p5), [#allocation3], %s243_s13 }
  0x32   : > { %s247_s16 = scalar_lea.vmem (!%p1855_p5), [#allocation2], %s1520_s14 }
  0x35   : > { %1735 = dma.done.wait (%p1851_p4), %s244_s15, 128  }
  0x36   : > { %1737 = vsyncadd (%p1851_p4), %s244_s15, 4294967168 }
  0x37   : > { %1739 = dma.done.wait (%p1843_p1), [#allocation5], 512  }
  0x38   : > { %1741 = vsyncadd (%p1843_p1), [#allocation5], 4294966784  ;;  %v1770_v0 = vmov 0.0   ;;  %vm1771_vm0 = vmmov 0   ;;  %v325_v1 = vld [vmem:[#allocation4 + $0x18] sm:$0xff]  ;;  %v324_v2 = vld [vmem:[#allocation4 + $0x10] sm:$0xff]  ;;  %v434_v12 = vlaneseq }
  0x39   : > { %1564 = vmatprep.subr.mxu0 %v1770_v0  ;;  %1572 = vmatprep.mubr.msk.f32.mxu0 %vm1771_vm0, %v1770_v0  ;;  %v323_v3 = vld [vmem:[#allocation4 + $0x8] sm:$0xff]  ;;  %v322_v4 = vld [vmem:[#allocation4] sm:$0xff]  ;;  %v321_v5 = vld [vmem:[%s247_s16] sm:$0xff]  ;;  %vm333_vm1 = vcmask 261120   ;;  %s1772_s27 = smov 116   ;;  %s1773_s18 = smov 124  }
  0x3a   : > { %1565 = vmatpush3.msra.mxu0 %v325_v1  ;;  %v1528_v6 = vld [vmem:[%s2156_s2] ss:$0 sm:$0xff]  ;;  %s1774_s24 = smov 112   ;;  %s1775_s28 = smov 120   ;;  %v1781_v10 = vmov 1983009808  }
  0x3b   : > { %1566 = vmatprep.subr.mxu0 %v1770_v0  ;;  %s1776_s29 = smov 104   ;;  %s1777_s30 = smov 108   ;;  %v432_v11 = vunpack.c.l.s4 %v1781_v10  ;;  %v1782_v13 = vmov 1934713408   ;;  %v435_v16 = vshrl.u32 %v434_v12, 7  ;;  %vm701_vm2 = vcmask 31744  }
  0x3c   : > { %1567 = vmatpush3.msra.mxu0 %v324_v2  ;;  %s1778_s7 = smov 96   ;;  %s1779_s8 = smov 100   ;;  %v496_v14 = vunpack.c.l.s4 %v1782_v13 }
  0x3d   : > { %1568 = vmatprep.subr.mxu0 %v1770_v0  ;;  %s1780_s9 = smov 64   ;;  %v433_v15 = vunpack.c.0.s8 %v432_v11  ;;  %p297_p1 = scmp.lt.s32.totalorder %s1756_s21, 1 }
  0x3e   : > { %1569 = vmatpush3.msra.mxu0 %v323_v3  ;;  %v497_v19 = vunpack.c.0.s8 %v496_v14 }
  0x3f   : > { %1570 = vmatprep.subr.mxu0 %v1770_v0  ;;  %v1919_v20 = vsub.s32 %v433_v15, %v435_v16  ;;  %s2173_s21 = smov (!%p297_p1, %s1756_s21), 1 }
  0x40   : > { %1571 = vmatpush3.msra.mxu0 %v322_v4  ;;  %v1928_v27 = vsub.s32 %v497_v19, %v435_v16  ;;  %s1972_s10 = sshll.u32 %s2173_s21, 6 }
  0x41   : > { %1573 = vmatmul.mubr.msk.f32.vlgmr.msra.gmra.mxu0 %vm333_vm1, %v321_v5  ;;  %s1984_s12 = scalar_lea.vmem %s2157_s3, %s1972_s10  ;;  %s2050_s15 = scalar_lea.vmem %s2158_s4, %s1972_s10 }
  0x42   : > { %s2106_s26 = scalar_lea.vmem %s2159_s5, %s1972_s10 }
 0x101   : > { %v403_v7 = vpop.f32.mrf.mxu0 }
 0x102   : > { %v404_v8 = vadd.f32 %v1528_v6, %v403_v7 }
 0x103   : > { %v1574_v9 = vpop.f32.mrf.mxu0 }
 0x104   : > { %414 = vrot.lane.b32.xlu1 %v404_v8, %s1772_s27  ;;  %408 = vrot.lane.b32.xlu0 %v404_v8, %s1773_s18 }
 0x108   : > { %417 = vrot.lane.b32.xlu1 %v404_v8, %s1774_s24  ;;  %411 = vrot.lane.b32.xlu0 %v404_v8, %s1775_s28 }
 0x10c   : > { %423 = vrot.lane.b32.xlu1 %v404_v8, %s1776_s29  ;;  %420 = vrot.lane.b32.xlu0 %v404_v8, %s1777_s30 }
 0x110   : > { %710 = vrot.lane.b32.xlu1 %v404_v8, %s1778_s7  ;;  %426 = vrot.lane.b32.xlu0 %v404_v8, %s1779_s8 }
 0x114   : > { %1014 = vrot.lane.b32.xlu1 %v404_v8, %s1780_s9 }
 0x176   : > { %v1916_v17 = vpop.permute.xlu1 %414  ;;  %v409_v18 = vpop.permute.xlu0 %408 }
 0x177   : > { %712 = vrot.lane.b32.xlu0 %v409_v18, %s1778_s7  ;;  %v445_v21 = vcombine.low %v409_v18, %v1916_v17  ;;  %v446_v22 = vcombine.high %v409_v18, %v1916_v17 }
 0x179   : > { %v453_v28 = vrot.slane %v445_v21, %v1919_v20  ;;  %v460_v29 = vrot.slane %v446_v22, %v1919_v20 }
 0x17a   : > { %v1923_v23 = vpop.permute.xlu1 %417  ;;  %v412_v24 = vpop.permute.xlu0 %411 }
 0x17b   : > { %v429_v25 = vcombine.low %v404_v8, %v412_v24  ;;  %v430_v26 = vcombine.high %v404_v8, %v412_v24  ;;  %716 = vrot.lane.b32.xlu0 %v1916_v17, %s1778_s7  ;;  %714 = vrot.lane.b32.xlu1 %v412_v24, %s1778_s7 }
 0x17d   : > { %v437_v30 = vrot.slane %v429_v25, %v1919_v20  ;;  %v444_v31 = vrot.slane %v430_v26, %v1919_v20 }
 0x17e   : > { %v1934_v32 = vpop.permute.xlu0 %420  ;;  %v1937_v37 = vpop.permute.xlu1 %423 }
 0x17f   : > { %v493_v33 = vcombine.low %v437_v30, %v453_v28  ;;  %v494_v34 = vcombine.high %v437_v30, %v453_v28  ;;  %v509_v35 = vcombine.low %v444_v31, %v460_v29  ;;  %v510_v36 = vcombine.high %v444_v31, %v460_v29  ;;  %718 = vrot.lane.b32.xlu1 %v1923_v23, %s1778_s7 }
 0x180   : > { %720 = vrot.lane.b32.xlu0 %v1934_v32, %s1778_s7  ;;  %v461_v42 = vcombine.low %v1923_v23, %v1937_v37  ;;  %v462_v43 = vcombine.high %v1923_v23, %v1937_v37 }
 0x181   : > { %v501_v38 = vrot.slane %v493_v33, %v1928_v27  ;;  %v508_v39 = vrot.slane %v494_v34, %v1928_v27  ;;  %v517_v40 = vrot.slane %v509_v35, %v1928_v27  ;;  %v524_v41 = vrot.slane %v510_v36, %v1928_v27 }
 0x182   : > { %v1951_v44 = vpop.permute.xlu0 %426  ;;  %v469_v55 = vrot.slane %v461_v42, %v1919_v20  ;;  %v476_v56 = vrot.slane %v462_v43, %v1919_v20 }
 0x183   : > { %v1530_v45 = vcombine.low %v501_v38, %v508_v39  ;;  %v1532_v46 = vcombine.high %v501_v38, %v508_v39  ;;  %v1534_v47 = vcombine.low %v517_v40, %v524_v41  ;;  %v1536_v48 = vcombine.high %v517_v40, %v524_v41  ;;  %722 = vrot.lane.b32.xlu1 %v1937_v37, %s1778_s7 }
 0x184   : > { %v477_v49 = vcombine.low %v1934_v32, %v1951_v44  ;;  %v478_v50 = vcombine.high %v1934_v32, %v1951_v44  ;;  %724 = vrot.lane.b32.xlu0 %v1951_v44, %s1778_s7 }
 0x185   : > { %v573_v51 = vrot.slane %v1530_v45, %v1919_v20  ;;  %v589_v52 = vrot.slane %v1532_v46, %v1919_v20  ;;  %v605_v53 = vrot.slane %v1534_v47, %v1919_v20  ;;  %v621_v54 = vrot.slane %v1536_v48, %v1919_v20 }
 0x186   : > { %v485_v57 = vrot.slane %v477_v49, %v1919_v20  ;;  %v492_v58 = vrot.slane %v478_v50, %v1919_v20 }
 0x187   : > { %v629_v59 = vcombine.low %v573_v51, %v589_v52  ;;  %v630_v60 = vcombine.high %v573_v51, %v589_v52  ;;  %v661_v61 = vcombine.low %v605_v53, %v621_v54  ;;  %v662_v62 = vcombine.high %v605_v53, %v621_v54  ;;  %1018 = vrot.lane.b32.xlu1 %v412_v24, %s1780_s9 }
 0x188   : > { %v525_v63 = vcombine.low %v469_v55, %v485_v57  ;;  %v526_v0 = vcombine.high %v469_v55, %v485_v57  ;;  %v541_v1 = vcombine.low %v476_v56, %v492_v58  ;;  %v542_v2 = vcombine.high %v476_v56, %v492_v58  ;;  %1016 = vrot.lane.b32.xlu0 %v409_v18, %s1780_s9 }
 0x189   : > { %v637_v3 = vrot.slane %v629_v59, %v1928_v27  ;;  %v644_v4 = vrot.slane %v630_v60, %v1928_v27  ;;  %v669_v5 = vrot.slane %v661_v61, %v1928_v27  ;;  %v676_v6 = vrot.slane %v662_v62, %v1928_v27 }
 0x18a   : > { %v533_v7 = vrot.slane %v525_v63, %v1928_v27  ;;  %v540_v8 = vrot.slane %v526_v0, %v1928_v27  ;;  %v549_v9 = vrot.slane %v541_v1, %v1928_v27  ;;  %v556_v10 = vrot.slane %v542_v2, %v1928_v27 }
 0x18b   : > { %v693_v11 = vcombine.low %v637_v3, %v669_v5  ;;  %v694_v12 = vcombine.high %v637_v3, %v669_v5  ;;  %v695_v13 = vcombine.low %v644_v4, %v676_v6  ;;  %v696_v14 = vcombine.high %v644_v4, %v676_v6  ;;  %1022 = vrot.lane.b32.xlu1 %v1923_v23, %s1780_s9 }
 0x18c   : > { %v1531_v15 = vcombine.low %v533_v7, %v540_v8  ;;  %v1533_v16 = vcombine.high %v533_v7, %v540_v8  ;;  %v1535_v18 = vcombine.low %v549_v9, %v556_v10  ;;  %v1537_v19 = vcombine.high %v549_v9, %v556_v10  ;;  %1020 = vrot.lane.b32.xlu0 %v1916_v17, %s1780_s9 }
 0x18d   : > { %702 = vst.msk [vmem:[%s1984_s12] sm:$0xff] %vm701_vm2, %v693_v11  ;;  %703 = vst.msk [vmem:[%s1984_s12 + $0x8] sm:$0xff] %vm701_vm2, %v694_v12 }
 0x18e   : > { %704 = vst.msk [vmem:[%s1984_s12 + $0x10] sm:$0xff] %vm701_vm2, %v695_v13  ;;  %705 = vst.msk [vmem:[%s1984_s12 + $0x18] sm:$0xff] %vm701_vm2, %v696_v14  ;;  %v580_v21 = vrot.slane %v1531_v15, %v1919_v20  ;;  %v596_v22 = vrot.slane %v1533_v16, %v1919_v20  ;;  %v612_v23 = vrot.slane %v1535_v18, %v1919_v20 }
 0x18f   : > { %v628_v24 = vrot.slane %v1537_v19, %v1919_v20  ;;  %1026 = vrot.lane.b32.xlu1 %v1937_v37, %s1780_s9 }
 0x190   : > { %v645_v17 = vcombine.low %v580_v21, %v596_v22  ;;  %v646_v25 = vcombine.high %v580_v21, %v596_v22  ;;  %1024 = vrot.lane.b32.xlu0 %v1934_v32, %s1780_s9  ;;  %v711_v32 = vpop.permute.xlu1 %710 }
 0x191   : > { %v677_v26 = vcombine.low %v612_v23, %v628_v24  ;;  %v678_v28 = vcombine.high %v612_v23, %v628_v24 }
 0x192   : > { %v653_v29 = vrot.slane %v645_v17, %v1928_v27  ;;  %v660_v30 = vrot.slane %v646_v25, %v1928_v27 }
 0x193   : > { %v685_v31 = vrot.slane %v677_v26, %v1928_v27  ;;  %v692_v33 = vrot.slane %v678_v28, %v1928_v27 }
 0x194   : > { %1028 = vrot.lane.b32.xlu0 %v1951_v44, %s1780_s9  ;;  %v2024_v38 = vpop.permute.xlu1 %1014 }
 0x195   : > { %v697_v34 = vcombine.low %v653_v29, %v685_v31  ;;  %v698_v35 = vcombine.high %v653_v29, %v685_v31  ;;  %v699_v36 = vcombine.low %v660_v30, %v692_v33  ;;  %v700_v37 = vcombine.high %v660_v30, %v692_v33 }
 0x197   : > { %706 = vst.msk [vmem:[%s1984_s12 + $0x20] sm:$0xff] %vm701_vm2, %v697_v34  ;;  %707 = vst.msk [vmem:[%s1984_s12 + $0x28] sm:$0xff] %vm701_vm2, %v698_v35 }
 0x198   : > { %708 = vst.msk [vmem:[%s1984_s12 + $0x30] sm:$0xff] %vm701_vm2, %v699_v36  ;;  %709 = vst.msk [vmem:[%s1984_s12 + $0x38] sm:$0xff] %vm701_vm2, %v700_v37 }
 0x1e9   : > { %v713_v39 = vpop.permute.xlu0 %712 }
 0x1ed   : > { %v715_v40 = vpop.permute.xlu1 %714  ;;  %v717_v41 = vpop.permute.xlu0 %716 }
 0x1ee   : > { %v734_v42 = vcombine.low %v711_v32, %v715_v40  ;;  %v735_v43 = vcombine.high %v711_v32, %v715_v40  ;;  %v750_v45 = vcombine.low %v713_v39, %v717_v41  ;;  %v751_v46 = vcombine.high %v713_v39, %v717_v41 }
 0x1f0   : > { %v742_v44 = vrot.slane %v734_v42, %v1919_v20  ;;  %v749_v47 = vrot.slane %v735_v43, %v1919_v20  ;;  %v758_v48 = vrot.slane %v750_v45, %v1919_v20  ;;  %v765_v49 = vrot.slane %v751_v46, %v1919_v20 }
 0x1f1   : > { %v719_v50 = vpop.permute.xlu1 %718 }
 0x1f2   : > { %v798_v51 = vcombine.low %v742_v44, %v758_v48  ;;  %v799_v52 = vcombine.high %v742_v44, %v758_v48  ;;  %v814_v53 = vcombine.low %v749_v47, %v765_v49  ;;  %v815_v54 = vcombine.high %v749_v47, %v765_v49  ;;  %v721_v55 = vpop.permute.xlu0 %720 }
 0x1f4   : > { %v806_v56 = vrot.slane %v798_v51, %v1928_v27  ;;  %v813_v57 = vrot.slane %v799_v52, %v1928_v27  ;;  %v822_v58 = vrot.slane %v814_v53, %v1928_v27  ;;  %v829_v59 = vrot.slane %v815_v54, %v1928_v27 }
 0x1f5   : > { %v723_v60 = vpop.permute.xlu1 %722 }
 0x1f6   : > { %v1538_v61 = vcombine.low %v806_v56, %v813_v57  ;;  %v1540_v62 = vcombine.high %v806_v56, %v813_v57  ;;  %v1542_v63 = vcombine.low %v822_v58, %v829_v59  ;;  %v1544_v0 = vcombine.high %v822_v58, %v829_v59  ;;  %v725_v1 = vpop.permute.xlu0 %724 }
 0x1f7   : > { %v766_v2 = vcombine.low %v719_v50, %v723_v60  ;;  %v767_v3 = vcombine.high %v719_v50, %v723_v60  ;;  %v782_v4 = vcombine.low %v721_v55, %v725_v1  ;;  %v783_v5 = vcombine.high %v721_v55, %v725_v1 }
 0x1f8   : > { %v878_v6 = vrot.slane %v1538_v61, %v1919_v20  ;;  %v894_v7 = vrot.slane %v1540_v62, %v1919_v20  ;;  %v910_v8 = vrot.slane %v1542_v63, %v1919_v20  ;;  %v926_v9 = vrot.slane %v1544_v0, %v1919_v20 }
 0x1f9   : > { %v774_v10 = vrot.slane %v766_v2, %v1919_v20  ;;  %v781_v11 = vrot.slane %v767_v3, %v1919_v20  ;;  %v790_v12 = vrot.slane %v782_v4, %v1919_v20  ;;  %v797_v13 = vrot.slane %v783_v5, %v1919_v20  ;;  %v1019_v19 = vpop.permute.xlu1 %1018 }
 0x1fa   : > { %v934_v14 = vcombine.low %v878_v6, %v894_v7  ;;  %v935_v15 = vcombine.high %v878_v6, %v894_v7  ;;  %v966_v16 = vcombine.low %v910_v8, %v926_v9  ;;  %v967_v18 = vcombine.high %v910_v8, %v926_v9  ;;  %v1017_v21 = vpop.permute.xlu0 %1016 }
 0x1fb   : > { %v830_v22 = vcombine.low %v774_v10, %v790_v12  ;;  %v831_v23 = vcombine.high %v774_v10, %v790_v12  ;;  %v846_v24 = vcombine.low %v781_v11, %v797_v13  ;;  %v847_v17 = vcombine.high %v781_v11, %v797_v13 }
 0x1fc   : > { %v942_v25 = vrot.slane %v934_v14, %v1928_v27  ;;  %v949_v26 = vrot.slane %v935_v15, %v1928_v27  ;;  %v974_v28 = vrot.slane %v966_v16, %v1928_v27  ;;  %v981_v29 = vrot.slane %v967_v18, %v1928_v27 }
 0x1fd   : > { %v838_v30 = vrot.slane %v830_v22, %v1928_v27  ;;  %v845_v31 = vrot.slane %v831_v23, %v1928_v27  ;;  %v854_v33 = vrot.slane %v846_v24, %v1928_v27  ;;  %v861_v34 = vrot.slane %v847_v17, %v1928_v27  ;;  %v1023_v44 = vpop.permute.xlu1 %1022 }
 0x1fe   : > { %v998_v35 = vcombine.low %v942_v25, %v974_v28  ;;  %v999_v36 = vcombine.high %v942_v25, %v974_v28  ;;  %v1000_v37 = vcombine.low %v949_v26, %v981_v29  ;;  %v1001_v32 = vcombine.high %v949_v26, %v981_v29  ;;  %v1021_v39 = vpop.permute.xlu0 %1020 }
 0x1ff   : > { %v1539_v40 = vcombine.low %v838_v30, %v845_v31  ;;  %v1541_v41 = vcombine.high %v838_v30, %v845_v31  ;;  %v1543_v42 = vcombine.low %v854_v33, %v861_v34  ;;  %v1545_v43 = vcombine.high %v854_v33, %v861_v34 }
 0x200   : > { %1006 = vst.msk [vmem:[%s2050_s15] sm:$0xff] %vm701_vm2, %v998_v35  ;;  %1007 = vst.msk [vmem:[%s2050_s15 + $0x8] sm:$0xff] %vm701_vm2, %v999_v36  ;;  %v1038_v45 = vcombine.low %v2024_v38, %v1019_v19  ;;  %v1039_v46 = vcombine.high %v2024_v38, %v1019_v19  ;;  %v1054_v47 = vcombine.low %v1017_v21, %v1021_v39 }
 0x201   : > { %1008 = vst.msk [vmem:[%s2050_s15 + $0x10] sm:$0xff] %vm701_vm2, %v1000_v37  ;;  %1009 = vst.msk [vmem:[%s2050_s15 + $0x18] sm:$0xff] %vm701_vm2, %v1001_v32  ;;  %v1055_v48 = vcombine.high %v1017_v21, %v1021_v39  ;;  %v885_v49 = vrot.slane %v1539_v40, %v1919_v20  ;;  %v901_v50 = vrot.slane %v1541_v41, %v1919_v20  ;;  %v1027_v9 = vpop.permute.xlu1 %1026 }
 0x202   : > { %v917_v51 = vrot.slane %v1543_v42, %v1919_v20  ;;  %v933_v52 = vrot.slane %v1545_v43, %v1919_v20  ;;  %v1046_v53 = vrot.slane %v1038_v45, %v1919_v20  ;;  %v1053_v54 = vrot.slane %v1039_v46, %v1919_v20  ;;  %v1025_v38 = vpop.permute.xlu0 %1024 }
 0x203   : > { %v1062_v55 = vrot.slane %v1054_v47, %v1919_v20  ;;  %v1069_v56 = vrot.slane %v1055_v48, %v1919_v20  ;;  %v950_v57 = vcombine.low %v885_v49, %v901_v50  ;;  %v951_v58 = vcombine.high %v885_v49, %v901_v50 }
 0x204   : > { %v982_v59 = vcombine.low %v917_v51, %v933_v52  ;;  %v983_v60 = vcombine.high %v917_v51, %v933_v52  ;;  %v1070_v21 = vcombine.low %v1023_v44, %v1027_v9  ;;  %v1071_v22 = vcombine.high %v1023_v44, %v1027_v9 }
 0x205   : > { %v1102_v61 = vcombine.low %v1046_v53, %v1062_v55  ;;  %v1103_v62 = vcombine.high %v1046_v53, %v1062_v55  ;;  %v1118_v63 = vcombine.low %v1053_v54, %v1069_v56  ;;  %v1119_v0 = vcombine.high %v1053_v54, %v1069_v56 }
 0x206   : > { %v958_v1 = vrot.slane %v950_v57, %v1928_v27  ;;  %v965_v2 = vrot.slane %v951_v58, %v1928_v27  ;;  %v990_v3 = vrot.slane %v982_v59, %v1928_v27  ;;  %v997_v4 = vrot.slane %v983_v60, %v1928_v27  ;;  %v1029_v10 = vpop.permute.xlu0 %1028 }
 0x207   : > { %v1110_v5 = vrot.slane %v1102_v61, %v1928_v27  ;;  %v1117_v6 = vrot.slane %v1103_v62, %v1928_v27  ;;  %v1126_v7 = vrot.slane %v1118_v63, %v1928_v27  ;;  %v1133_v8 = vrot.slane %v1119_v0, %v1928_v27 }
 0x208   : > { %v1002_v11 = vcombine.low %v958_v1, %v990_v3  ;;  %v1003_v12 = vcombine.high %v958_v1, %v990_v3  ;;  %v1004_v13 = vcombine.low %v965_v2, %v997_v4  ;;  %v1005_v14 = vcombine.high %v965_v2, %v997_v4 }
 0x209   : > { %v1546_v15 = vcombine.low %v1110_v5, %v1117_v6  ;;  %v1548_v16 = vcombine.high %v1110_v5, %v1117_v6  ;;  %v1550_v18 = vcombine.low %v1126_v7, %v1133_v8  ;;  %v1552_v19 = vcombine.high %v1126_v7, %v1133_v8 }
 0x20a   : > { %1010 = vst.msk [vmem:[%s2050_s15 + $0x20] sm:$0xff] %vm701_vm2, %v1002_v11  ;;  %1011 = vst.msk [vmem:[%s2050_s15 + $0x28] sm:$0xff] %vm701_vm2, %v1003_v12  ;;  %v1086_v23 = vcombine.low %v1025_v38, %v1029_v10  ;;  %v1087_v24 = vcombine.high %v1025_v38, %v1029_v10  ;;  %v1078_v29 = vrot.slane %v1070_v21, %v1919_v20 }
 0x20b   : > { %1012 = vst.msk [vmem:[%s2050_s15 + $0x30] sm:$0xff] %vm701_vm2, %v1004_v13  ;;  %1013 = vst.msk [vmem:[%s2050_s15 + $0x38] sm:$0xff] %vm701_vm2, %v1005_v14  ;;  %v1182_v17 = vrot.slane %v1546_v15, %v1919_v20  ;;  %v1198_v25 = vrot.slane %v1548_v16, %v1919_v20  ;;  %v1214_v26 = vrot.slane %v1550_v18, %v1919_v20 }
 0x20c   : > { %v1230_v28 = vrot.slane %v1552_v19, %v1919_v20  ;;  %v1085_v30 = vrot.slane %v1071_v22, %v1919_v20  ;;  %v1094_v31 = vrot.slane %v1086_v23, %v1919_v20  ;;  %v1101_v33 = vrot.slane %v1087_v24, %v1919_v20 }
 0x20d   : > { %v1238_v34 = vcombine.low %v1182_v17, %v1198_v25  ;;  %v1239_v35 = vcombine.high %v1182_v17, %v1198_v25 }
 0x20e   : > { %v1270_v36 = vcombine.low %v1214_v26, %v1230_v28  ;;  %v1271_v37 = vcombine.high %v1214_v26, %v1230_v28  ;;  %v1134_v32 = vcombine.low %v1078_v29, %v1094_v31  ;;  %v1135_v39 = vcombine.high %v1078_v29, %v1094_v31 }
 0x20f   : > { %v1150_v40 = vcombine.low %v1085_v30, %v1101_v33  ;;  %v1151_v41 = vcombine.high %v1085_v30, %v1101_v33  ;;  %v1246_v42 = vrot.slane %v1238_v34, %v1928_v27  ;;  %v1253_v43 = vrot.slane %v1239_v35, %v1928_v27 }
 0x210   : > { %v1278_v45 = vrot.slane %v1270_v36, %v1928_v27  ;;  %v1285_v46 = vrot.slane %v1271_v37, %v1928_v27  ;;  %v1142_v44 = vrot.slane %v1134_v32, %v1928_v27  ;;  %v1149_v47 = vrot.slane %v1135_v39, %v1928_v27 }
 0x211   : > { %v1158_v48 = vrot.slane %v1150_v40, %v1928_v27  ;;  %v1165_v49 = vrot.slane %v1151_v41, %v1928_v27 }
 0x212   : > { %v1302_v50 = vcombine.low %v1246_v42, %v1278_v45  ;;  %v1303_v51 = vcombine.high %v1246_v42, %v1278_v45  ;;  %v1304_v52 = vcombine.low %v1253_v43, %v1285_v46  ;;  %v1305_v53 = vcombine.high %v1253_v43, %v1285_v46 }
 0x213   : > { %v1547_v54 = vcombine.low %v1142_v44, %v1149_v47  ;;  %v1549_v55 = vcombine.high %v1142_v44, %v1149_v47  ;;  %v1551_v56 = vcombine.low %v1158_v48, %v1165_v49  ;;  %v1553_v38 = vcombine.high %v1158_v48, %v1165_v49 }
 0x214   : > { %1310 = vst.msk [vmem:[%s2106_s26] sm:$0xff] %vm701_vm2, %v1302_v50  ;;  %1311 = vst.msk [vmem:[%s2106_s26 + $0x8] sm:$0xff] %vm701_vm2, %v1303_v51 }
 0x215   : > { %1312 = vst.msk [vmem:[%s2106_s26 + $0x10] sm:$0xff] %vm701_vm2, %v1304_v52  ;;  %1313 = vst.msk [vmem:[%s2106_s26 + $0x18] sm:$0xff] %vm701_vm2, %v1305_v53  ;;  %v1189_v57 = vrot.slane %v1547_v54, %v1919_v20  ;;  %v1205_v58 = vrot.slane %v1549_v55, %v1919_v20  ;;  %v1221_v59 = vrot.slane %v1551_v56, %v1919_v20 }
 0x216   : > { %v1237_v60 = vrot.slane %v1553_v38, %v1919_v20 }
 0x217   : > { %v1254_v61 = vcombine.low %v1189_v57, %v1205_v58  ;;  %v1255_v62 = vcombine.high %v1189_v57, %v1205_v58 }
 0x218   : > { %v1286_v63 = vcombine.low %v1221_v59, %v1237_v60  ;;  %v1287_v0 = vcombine.high %v1221_v59, %v1237_v60 }
 0x219   : > { %v1262_v1 = vrot.slane %v1254_v61, %v1928_v27  ;;  %v1269_v2 = vrot.slane %v1255_v62, %v1928_v27 }
 0x21a   : > { %v1294_v3 = vrot.slane %v1286_v63, %v1928_v27  ;;  %v1301_v4 = vrot.slane %v1287_v0, %v1928_v27 }
 0x21c   : > { %v1306_v5 = vcombine.low %v1262_v1, %v1294_v3  ;;  %v1307_v6 = vcombine.high %v1262_v1, %v1294_v3  ;;  %v1308_v7 = vcombine.low %v1269_v2, %v1301_v4  ;;  %v1309_v8 = vcombine.high %v1269_v2, %v1301_v4 }
 0x21e   : > { %1314 = vst.msk [vmem:[%s2106_s26 + $0x20] sm:$0xff] %vm701_vm2, %v1306_v5  ;;  %1315 = vst.msk [vmem:[%s2106_s26 + $0x28] sm:$0xff] %vm701_vm2, %v1307_v6 }
 0x21f   : > { %1316 = vst.msk [vmem:[%s2106_s26 + $0x30] sm:$0xff] %vm701_vm2, %v1308_v7  ;;  %1317 = vst.msk [vmem:[%s2106_s26 + $0x38] sm:$0xff] %vm701_vm2, %v1309_v8 }
 0x220 PF: > { %s20_s23 = sadd.s32 1, %s1764_s23   ;;  %s2165_s18 = smov %s1748_s19 }
 0x221   : > { %p17_p4 = scmp.ge.s32.totalorder %s20_s23, 4   ;;  %s2166_s19 = smov %s1752_s20 }
 0x222   : > { %s2167_s20 = smov %s1887_s17  ;;  %s2168_s21 = smov %s1760_s22 }
 0x223   : > { %s2169_s22 = smov %s2171_s6  ;;  %19 = sbr.rel (!%p17_p4) target bundleno = 5 (0x5), region = 100 }
 0x228   :  { %1389 = vsyncpa [#allocation3], 1 }
 0x229   :  { %1391 = vsyncpa [#allocation3 + $0x1], 1 }
 0x22a   :  { %1392 = vsyncpa [#allocation5], 1 }

</bundles_post_ra>
